<compile_context>
chip_gen: v6e
topology: v6e:2x2x1
jax: 0.10.0
libtpu: 0.0.40
codegen_flags: <defaults>
</compile_context>

<pallas_src>
import functools

import jax
import jax.numpy as jnp
from jax.experimental import pallas as pl
from jax.experimental.pallas import tpu as pltpu


def _ffn_kernel(x_ref, w1_ref, b1_ref, w2_ref, b2_ref, o_ref, acc_ref):
    k = pl.program_id(1)

    @pl.when(k == 0)
    def _():
        acc_ref[...] = jnp.zeros_like(acc_ref)

    # First GEMM: (tm, d_model) @ (d_model, th) -> f32 (tm, th)
    h = jnp.dot(x_ref[...], w1_ref[...], preferred_element_type=jnp.float32)
    # Bias + exact GELU (erf-based, matches PyTorch nn.GELU default) in f32.
    h = h + b1_ref[...]
    h = 0.5 * h * (1.0 + jax.lax.erf(h * jnp.float32(0.7071067811865476)))
    # Second GEMM: downcast LHS to the weight dtype (bf16) -> f32 accumulate.
    acc_ref[...] += jnp.dot(
        h.astype(w2_ref.dtype), w2_ref[...], preferred_element_type=jnp.float32
    )

    @pl.when(k == pl.num_programs(1) - 1)
    def _():
        o_ref[...] = (acc_ref[...] + b2_ref[...]).astype(o_ref.dtype)


def _round_up(x, m):
    return (x + m - 1) // m * m


@functools.partial(jax.jit, static_argnames=("tm", "th", "compute_dtype"))
def feed_forward(x, w1, b1, w2, b2, *, tm=256, th=512,
                 compute_dtype=jnp.bfloat16):
    """x: (..., d_model) -> (..., d_model)."""
    orig_shape = x.shape
    orig_dtype = x.dtype
    d_model = orig_shape[-1]
    hidden = w1.shape[1]

    x2d = x.reshape(-1, d_model)
    n = x2d.shape[0]

    # Row tile: multiple of 8 (sublane); clamp for tiny inputs so we don't
    # run the MXU over mostly-padding tiles.
    tm_eff = min(tm, _round_up(n, 8))
    n_pad = _round_up(n, tm_eff)

    # Hidden tile: multiple of 128 (lane); clamp similarly.
    th_eff = min(th, _round_up(hidden, 128))
    h_pad = _round_up(hidden, th_eff)

    # Zero-pad rows / hidden. Padded hidden columns give GELU(0)*0 = 0, so the
    # result is unchanged; padded rows are sliced off at the end.
    if n_pad != n:
        x2d = jnp.pad(x2d, ((0, n_pad - n), (0, 0)))
    if h_pad != hidden:
        w1 = jnp.pad(w1, ((0, 0), (0, h_pad - hidden)))
        b1 = jnp.pad(b1, ((0, h_pad - hidden),))
        w2 = jnp.pad(w2, ((0, h_pad - hidden), (0, 0)))

    # bf16 MXU operands (halves weight/activation DMA bytes); biases stay f32.
    x2d = x2d.astype(compute_dtype)
    w1c = w1.astype(compute_dtype)
    w2c = w2.astype(compute_dtype)
    b1_2d = b1.reshape(1, h_pad).astype(jnp.float32)
    b2_2d = b2.reshape(1, d_model).astype(jnp.float32)

    grid = (n_pad // tm_eff, h_pad // th_eff)

    out = pl.pallas_call(
        _ffn_kernel,
        out_shape=jax.ShapeDtypeStruct((n_pad, d_model), orig_dtype),
        grid_spec=pltpu.PrefetchScalarGridSpec(
            num_scalar_prefetch=0,
            grid=grid,
            in_specs=[
                pl.BlockSpec((tm_eff, d_model), lambda i, k: (i, 0)),   # x
                pl.BlockSpec((d_model, th_eff), lambda i, k: (0, k)),   # w1
                pl.BlockSpec((1, th_eff), lambda i, k: (0, k)),         # b1
                pl.BlockSpec((th_eff, d_model), lambda i, k: (k, 0)),   # w2
                pl.BlockSpec((1, d_model), lambda i, k: (0, 0)),        # b2
            ],
            out_specs=pl.BlockSpec((tm_eff, d_model), lambda i, k: (i, 0)),
            scratch_shapes=[pltpu.VMEM((tm_eff, d_model), jnp.float32)],
        ),
        compiler_params=pltpu.CompilerParams(
            dimension_semantics=("parallel", "arbitrary"),
            vmem_limit_bytes=48 * 1024 * 1024,
        ),
    )(x2d, w1c, b1_2d, w2c, b2_2d)

    if n_pad != n:
        out = out[:n]
    return out.reshape(orig_shape)


def init_feed_forward_params(key, d_model, hidden_scale=4, dtype=jnp.float32):
    """Deterministic init mimicking nn.Linear default (U[-1/sqrt(fan_in), ...])."""
    hidden = int(d_model * hidden_scale)
    k1, k2, k3, k4 = jax.random.split(key, 4)
    lim1 = 1.0 / jnp.sqrt(d_model)
    lim2 = 1.0 / jnp.sqrt(hidden)
    # Stored as (in, out) so the kernel does x @ W (PyTorch stores (out, in)).
    w1 = jax.random.uniform(k1, (d_model, hidden), dtype, -lim1, lim1)
    b1 = jax.random.uniform(k2, (hidden,), dtype, -lim1, lim1)
    w2 = jax.random.uniform(k3, (hidden, d_model), dtype, -lim2, lim2)
    b2 = jax.random.uniform(k4, (d_model,), dtype, -lim2, lim2)
    return w1, b1, w2, b2


if __name__ == "__main__":
    key = jax.random.PRNGKey(0)
    k_x, k_p = jax.random.split(key)

    # Small but lane-dense shapes: d_model=128 -> hidden=512.
    batch, seq, d_model = 2, 8, 128
    x = jax.random.normal(k_x, (batch, seq, d_model), dtype=jnp.float32)
    w1, b1, w2, b2 = init_feed_forward_params(k_p, d_model, hidden_scale=4)

    # Pure-JAX f32 reference.
    h_ref = x @ w1 + b1
    h_ref = 0.5 * h_ref * (1.0 + jax.lax.erf(h_ref / jnp.sqrt(2.0)))
    ref = h_ref @ w2 + b2

    # 1) f32 compute path: must match the reference tightly.
    out_f32 = feed_forward(x, w1, b1, w2, b2, compute_dtype=jnp.float32)
    out_f32 = jax.block_until_ready(out_f32)
    assert out_f32.shape == (batch, seq, d_model)
    assert jnp.allclose(out_f32, ref, atol=1e-5, rtol=1e-5)

    # 2) Default bf16-MXU path (f32 accumulation): looser tolerance.
    out_bf16 = feed_forward(x, w1, b1, w2, b2)
    out_bf16 = jax.block_until_ready(out_bf16)
    assert out_bf16.shape == (batch, seq, d_model)
    assert jnp.allclose(out_bf16, ref, atol=5e-2, rtol=5e-2)

    print("KERNEL_OK")
</pallas_src>

<mosaic_0001>
module attributes {stable_mosaic.version = 11 : i64} {
  func.func @_ffn_kernel(%arg0: i32, %arg1: i32, %arg2: memref<16x128xf32, #tpu.memory_space<vmem>>, %arg3: memref<128x512xf32, #tpu.memory_space<vmem>>, %arg4: memref<1x512xf32, #tpu.memory_space<vmem>>, %arg5: memref<512x128xf32, #tpu.memory_space<vmem>>, %arg6: memref<1x128xf32, #tpu.memory_space<vmem>>, %arg7: memref<16x128xf32, #tpu.memory_space<vmem>>, %arg8: memref<16x128xf32, #tpu.memory_space<vmem>>) attributes {dimension_semantics = [#tpu.dimension_semantics<parallel>, #tpu.dimension_semantics<arbitrary>], iteration_bounds = array<i64: 1, 1>, scalar_prefetch = 0 : i64, scratch_operands = 1 : i64, tpu.core_type = #tpu.core_type<tc>, window_params = [{transform_indices = @transform_0, window_bounds = array<i64: 16, 128>}, {transform_indices = @transform_1, window_bounds = array<i64: 128, 512>}, {transform_indices = @transform_2, window_bounds = array<i64: 1, 512>}, {transform_indices = @transform_3, window_bounds = array<i64: 512, 128>}, {pipeline_mode = #tpu.pipeline_mode<synchronous>, transform_indices = @transform_4, window_bounds = array<i64: 1, 128>}, {transform_indices = @transform_5, window_bounds = array<i64: 16, 128>}]} {
    %c0_i32 = arith.constant 0 : i32
    %0 = arith.cmpi eq, %arg1, %c0_i32 : i32
    %1 = arith.extui %0 : i1 to i32
    %c0_i32_0 = arith.constant 0 : i32
    %2 = arith.cmpi ne, %1, %c0_i32_0 : i32
    scf.if %2 {
      %cst_18 = arith.constant 0.000000e+00 : f32
      %25 = vector.broadcast %cst_18 : f32 to vector<16x128xf32>
      %c0_19 = arith.constant 0 : index
      %c0_20 = arith.constant 0 : index
      %26 = vector.load %arg8[%c0_19, %c0_20] : memref<16x128xf32, #tpu.memory_space<vmem>>, vector<16x128xf32>
      tpu.vector_store %arg8[%c0_19, %c0_20], %25 {strides = array<i32>} : memref<16x128xf32, #tpu.memory_space<vmem>>, vector<16x128xf32>,
    } else {
    }
    %c0 = arith.constant 0 : index
    %c0_1 = arith.constant 0 : index
    %3 = vector.load %arg2[%c0, %c0_1] : memref<16x128xf32, #tpu.memory_space<vmem>>, vector<16x128xf32>
    %c0_2 = arith.constant 0 : index
    %c0_3 = arith.constant 0 : index
    %4 = vector.load %arg3[%c0_2, %c0_3] : memref<128x512xf32, #tpu.memory_space<vmem>>, vector<128x512xf32>
    %cst = arith.constant dense<0.000000e+00> : vector<16x512xf32>
    %5 = tpu.matmul %3, %4, %cst {dimension_numbers = #tpu.dot_dimension_numbers<[1], [0], [0], [1], [0, 0, 1, 1], [], []>} : vector<16x128xf32>, vector<128x512xf32>, vector<16x512xf32> -> vector<16x512xf32>
    %c0_4 = arith.constant 0 : index
    %c0_5 = arith.constant 0 : index
    %6 = vector.load %arg4[%c0_4, %c0_5] : memref<1x512xf32, #tpu.memory_space<vmem>>, vector<1x512xf32>
    %7 = vector.broadcast %6 : vector<1x512xf32> to vector<16x512xf32>
    %8 = arith.addf %5, %7 : vector<16x512xf32>
    %cst_6 = arith.constant 5.000000e-01 : f32
    %9 = vector.broadcast %cst_6 : f32 to vector<16x512xf32>
    %10 = arith.mulf %9, %8 : vector<16x512xf32>
    %cst_7 = arith.constant 0.707106769 : f32
    %11 = vector.broadcast %cst_7 : f32 to vector<16x512xf32>
    %12 = arith.mulf %8, %11 : vector<16x512xf32>
    %13 = math.erf %12 : vector<16x512xf32>
    %cst_8 = arith.constant 1.000000e+00 : f32
    %14 = vector.broadcast %cst_8 : f32 to vector<16x512xf32>
    %15 = arith.addf %14, %13 : vector<16x512xf32>
    %16 = arith.mulf %10, %15 : vector<16x512xf32>
    %c0_9 = arith.constant 0 : index
    %c0_10 = arith.constant 0 : index
    %17 = vector.load %arg8[%c0_9, %c0_10] : memref<16x128xf32, #tpu.memory_space<vmem>>, vector<16x128xf32>
    %c0_11 = arith.constant 0 : index
    %c0_12 = arith.constant 0 : index
    %18 = vector.load %arg5[%c0_11, %c0_12] : memref<512x128xf32, #tpu.memory_space<vmem>>, vector<512x128xf32>
    %cst_13 = arith.constant dense<0.000000e+00> : vector<16x128xf32>
    %19 = tpu.matmul %16, %18, %cst_13 {dimension_numbers = #tpu.dot_dimension_numbers<[1], [0], [0], [1], [0, 0, 1, 1], [], []>} : vector<16x512xf32>, vector<512x128xf32>, vector<16x128xf32> -> vector<16x128xf32>
    %20 = arith.addf %17, %19 : vector<16x128xf32>
    %c0_14 = arith.constant 0 : index
    %c0_15 = arith.constant 0 : index
    %21 = vector.load %arg8[%c0_14, %c0_15] : memref<16x128xf32, #tpu.memory_space<vmem>>, vector<16x128xf32>
    tpu.vector_store %arg8[%c0_14, %c0_15], %20 {strides = array<i32>} : memref<16x128xf32, #tpu.memory_space<vmem>>, vector<16x128xf32>,
    %c0_i32_16 = arith.constant 0 : i32
    %22 = arith.cmpi eq, %arg1, %c0_i32_16 : i32
    %23 = arith.extui %22 : i1 to i32
    %c0_i32_17 = arith.constant 0 : i32
    %24 = arith.cmpi ne, %23, %c0_i32_17 : i32
    scf.if %24 {
      %c0_18 = arith.constant 0 : index
      %c0_19 = arith.constant 0 : index
      %25 = vector.load %arg8[%c0_18, %c0_19] : memref<16x128xf32, #tpu.memory_space<vmem>>, vector<16x128xf32>
      %c0_20 = arith.constant 0 : index
      %c0_21 = arith.constant 0 : index
      %26 = vector.load %arg6[%c0_20, %c0_21] : memref<1x128xf32, #tpu.memory_space<vmem>>, vector<1x128xf32>
      %27 = vector.broadcast %26 : vector<1x128xf32> to vector<16x128xf32>
      %28 = arith.addf %25, %27 : vector<16x128xf32>
      %c0_22 = arith.constant 0 : index
      %c0_23 = arith.constant 0 : index
      %29 = vector.load %arg7[%c0_22, %c0_23] : memref<16x128xf32, #tpu.memory_space<vmem>>, vector<16x128xf32>
      tpu.vector_store %arg7[%c0_22, %c0_23], %28 {strides = array<i32>} : memref<16x128xf32, #tpu.memory_space<vmem>>, vector<16x128xf32>,
    } else {
    }
    return
  }
  func.func @transform_0(%arg0: i32, %arg1: i32) -> (i32, i32) {
    %c0_i32 = arith.constant 0 : i32
    %c0_i32_0 = arith.constant 0 : i32
    return %arg0, %c0_i32 : i32, i32
  }
  func.func @transform_1(%arg0: i32, %arg1: i32) -> (i32, i32) {
    %c0_i32 = arith.constant 0 : i32
    %c0_i32_0 = arith.constant 0 : i32
    return %c0_i32, %arg1 : i32, i32
  }
  func.func @transform_2(%arg0: i32, %arg1: i32) -> (i32, i32) {
    %c0_i32 = arith.constant 0 : i32
    %c0_i32_0 = arith.constant 0 : i32
    return %c0_i32, %arg1 : i32, i32
  }
  func.func @transform_3(%arg0: i32, %arg1: i32) -> (i32, i32) {
    %c0_i32 = arith.constant 0 : i32
    %c0_i32_0 = arith.constant 0 : i32
    return %arg1, %c0_i32 : i32, i32
  }
  func.func @transform_4(%arg0: i32, %arg1: i32) -> (i32, i32) {
    %c0_i32 = arith.constant 0 : i32
    %c0_i32_0 = arith.constant 0 : i32
    %c0_i32_1 = arith.constant 0 : i32
    return %c0_i32, %c0_i32_0 : i32, i32
  }
  func.func @transform_5(%arg0: i32, %arg1: i32) -> (i32, i32) {
    %c0_i32 = arith.constant 0 : i32
    %c0_i32_0 = arith.constant 0 : i32
    return %arg0, %c0_i32 : i32, i32
  }
}

</mosaic_0001>

<bundles_post_ra>
// kernel: feed_forward.1
= control target key start
LH: loop header
LB: loop body
LE: loop exit
PB: predicated region body
PF: predicated region fallthrough
CT: control target
= control target key end

     0   :  { %10 = vsyncpa [#allocation4], 0  ;;  %s862_s0 = inlined_call_operand.hbm [shape: f32[16,128], index: 0, kind: input, shape index: {}]   ;;  %s863_s1 = inlined_call_operand.hbm [shape: f32[128,512], index: 1, kind: input, shape index: {}]   ;;  %s864_s2 = inlined_call_operand.vmem [shape: f32[1,512], index: 2, kind: input, shape index: {}]   ;;  %s865_s3 = inlined_call_operand.hbm [shape: f32[512,128], index: 3, kind: input, shape index: {}]   ;;  %s866_s4 = inlined_call_operand.vmem [shape: f32[1,128], index: 4, kind: input, shape index: {}]   ;;  %s867_s5 = inlined_call_operand.hbm [shape: f32[16,128], index: 5, kind: output, shape index: {}]  }
   0x1   :  { %11 = vsyncpa [#allocation7], 0 }
   0x2   :  { %12 = vsyncpa [#allocation5], 0  ;;  %s792_s18 = smov [#allocation6]  }
   0x3   :  { %s30_s19 = sshll.u32 %s792_s18, 4  ;;  %s31_s19 = int_to_ptr.vmem [resolvable:$true] %s30_s19 }
   0x4   :  { %s714_s20 = scalar_lea.vmem %s31_s19, 8192  ;;  %p719_p1 = scmp.lt.s32.totalorder %s31_s19, %s31_s19 }
   0x5   :  { %p715_p0 = scmp.ne.s32.totalorder %s31_s19, %s714_s20  ;;  %p720_p2 = scmp.lt.s32.totalorder %s714_s20, %s714_s20 }
   0x7   :  { %p721_p3 = por %p720_p2, %p719_p1 }
   0x9   :  { %p722_p4 = pnand %p721_p3, %p715_p0 }
   0xb   :  { %725 = shalt.err (!%p722_p4)
}
   0xc   :  { %s793_s21 = smov 512   ;;  %s794_s22 = smov 32  }
   0xd   :  { %36 = dma.hbm_to_vmem [thread:$0]  %s863_s1, 8192, %s31_s19, [#allocation7], %s793_s21, %s793_s21, %s794_s22  }
   0xe   :  { %s795_s25 = smov [#allocation3]  }
   0xf   :  { %s18_s26 = sshll.u32 %s795_s25, 4  ;;  %s19_s26 = int_to_ptr.vmem [resolvable:$true] %s18_s26 }
  0x10   :  { %s734_s27 = scalar_lea.vmem %s19_s26, 256  ;;  %p739_p6 = scmp.lt.s32.totalorder %s19_s26, %s19_s26 }
  0x11   :  { %p735_p5 = scmp.ne.s32.totalorder %s19_s26, %s734_s27  ;;  %p740_p7 = scmp.lt.s32.totalorder %s734_s27, %s734_s27 }
  0x13   :  { %p741_p8 = por %p740_p7, %p739_p6 }
  0x15   :  { %p742_p9 = pnand %p741_p8, %p735_p5 }
  0x17   :  { %745 = shalt.err (!%p742_p9)
}
  0x18   :  { %s796_s28 = smov 128   ;;  %s797_s29 = smov 8  }
  0x19   :  { %24 = dma.hbm_to_vmem [thread:$0]  %s862_s0, 256, %s19_s26, [#allocation4], %s796_s28, %s796_s28, %s797_s29  }
  0x1a   :  { %s798_s1 = smov [#allocation8]  }
  0x1b   :  { %s44_s7 = sshll.u32 %s798_s1, 4  ;;  %s45_s7 = int_to_ptr.vmem [resolvable:$true] %s44_s7 }
  0x1c   :  { %s754_s8 = scalar_lea.vmem %s45_s7, 8192  ;;  %p759_p11 = scmp.lt.s32.totalorder %s45_s7, %s45_s7 }
  0x1d   :  { %p755_p10 = scmp.ne.s32.totalorder %s45_s7, %s754_s8  ;;  %p760_p12 = scmp.lt.s32.totalorder %s754_s8, %s754_s8 }
  0x1f   :  { %p761_p13 = por %p760_p12, %p759_p11 }
  0x21   :  { %p762_p0 = pnand %p761_p13, %p755_p10 }
  0x23   :  { %765 = shalt.err (!%p762_p0)
}
  0x24   :  { %50 = dma.hbm_to_vmem [thread:$0]  %s865_s3, 8192, %s45_s7, [#allocation7], %s796_s28, %s796_s28, %s797_s29  }
  0x25   :  { %786 = dma.done.wait [#allocation4], 256  }
  0x26   :  { %787 = vsyncadd [#allocation4], 4294967040 }
  0x27   :  { %788 = dma.done.wait [#allocation7], 16384  }
  0x28   :  { %789 = vsyncadd [#allocation7], 4294950912  ;;  %v799_v0 = vmov 0.0   ;;  %v131_v1 = vld [vmem:[#allocation6 + $0x1e8] sm:$0xff]  ;;  %v133_v2 = vld [vmem:[#allocation6 + $0x1f8] sm:$0xff]  ;;  %s800_s12 = smov [#allocation9]  }
  0x29   :  { %220 = vmatprep.mubr.f32.mxu0 %v799_v0  ;;  %297 = vmatprep.mubr.f32.mxu1 %v799_v0  ;;  %v130_v3 = vld [vmem:[#allocation6 + $0x1e0] sm:$0xff]  ;;  %v132_v4 = vld [vmem:[#allocation6 + $0x1f0] sm:$0xff]  ;;  %v127_v5 = vld [vmem:[#allocation6 + $0x1c8] sm:$0xff]  ;;  %s591_s13 = sshll.u32 %s800_s12, 4  ;;  %s592_s13 = int_to_ptr.vmem [resolvable:$true] %s591_s13 }
  0x2a   :  { %156 = vmatprep.subr.mxu0 %v131_v1  ;;  %233 = vmatprep.subr.mxu1 %v133_v2  ;;  %v129_v6 = vld [vmem:[#allocation6 + $0x1d8] sm:$0xff]  ;;  %v126_v7 = vld [vmem:[#allocation6 + $0x1c0] sm:$0xff]  ;;  %v128_v8 = vld [vmem:[#allocation6 + $0x1d0] sm:$0xff]  ;;  %s766_s14 = scalar_lea.vmem %s592_s13, 256  ;;  %p771_p2 = scmp.lt.s32.totalorder %s592_s13, %s592_s13 }
  0x2b   :  { %157 = vmatpush1.msra.mxu0 %v130_v3  ;;  %234 = vmatpush1.msra.mxu1 %v132_v4  ;;  %v123_v9 = vld [vmem:[#allocation6 + $0x1a8] sm:$0xff]  ;;  %v125_v10 = vld [vmem:[#allocation6 + $0x1b8] sm:$0xff]  ;;  %v122_v11 = vld [vmem:[#allocation6 + $0x1a0] sm:$0xff]  ;;  %p767_p1 = scmp.ne.s32.totalorder %s592_s13, %s766_s14  ;;  %p772_p3 = scmp.lt.s32.totalorder %s766_s14, %s766_s14 }
  0x2c   :  { %158 = vmatprep.subr.mxu0 %v127_v5  ;;  %235 = vmatprep.subr.mxu1 %v129_v6  ;;  %v124_v12 = vld [vmem:[#allocation6 + $0x1b0] sm:$0xff]  ;;  %v119_v13 = vld [vmem:[#allocation6 + $0x188] sm:$0xff]  ;;  %v121_v14 = vld [vmem:[#allocation6 + $0x198] sm:$0xff] }
  0x2d   :  { %159 = vmatpush1.msra.mxu0 %v126_v7  ;;  %236 = vmatpush1.msra.mxu1 %v128_v8  ;;  %v118_v15 = vld [vmem:[#allocation6 + $0x180] sm:$0xff]  ;;  %v120_v16 = vld [vmem:[#allocation6 + $0x190] sm:$0xff]  ;;  %v115_v17 = vld [vmem:[#allocation6 + $0x168] sm:$0xff]  ;;  %p773_p4 = por %p772_p3, %p771_p2 }
  0x2e   :  { %160 = vmatprep.subr.mxu0 %v123_v9  ;;  %237 = vmatprep.subr.mxu1 %v125_v10  ;;  %v117_v18 = vld [vmem:[#allocation6 + $0x178] sm:$0xff]  ;;  %v114_v19 = vld [vmem:[#allocation6 + $0x160] sm:$0xff]  ;;  %v116_v20 = vld [vmem:[#allocation6 + $0x170] sm:$0xff] }
  0x2f   :  { %161 = vmatpush1.msra.mxu0 %v122_v11  ;;  %238 = vmatpush1.msra.mxu1 %v124_v12  ;;  %v111_v21 = vld [vmem:[#allocation6 + $0x148] sm:$0xff]  ;;  %v113_v22 = vld [vmem:[#allocation6 + $0x158] sm:$0xff]  ;;  %v110_v23 = vld [vmem:[#allocation6 + $0x140] sm:$0xff]  ;;  %p774_p5 = pnand %p773_p4, %p767_p1 }
  0x30   :  { %162 = vmatprep.subr.mxu0 %v119_v13  ;;  %239 = vmatprep.subr.mxu1 %v121_v14  ;;  %v112_v24 = vld [vmem:[#allocation6 + $0x150] sm:$0xff]  ;;  %v107_v25 = vld [vmem:[#allocation6 + $0x128] sm:$0xff]  ;;  %v109_v26 = vld [vmem:[#allocation6 + $0x138] sm:$0xff] }
  0x31   :  { %163 = vmatpush1.msra.mxu0 %v118_v15  ;;  %240 = vmatpush1.msra.mxu1 %v120_v16  ;;  %v106_v27 = vld [vmem:[#allocation6 + $0x120] sm:$0xff]  ;;  %v108_v28 = vld [vmem:[#allocation6 + $0x130] sm:$0xff]  ;;  %v103_v29 = vld [vmem:[#allocation6 + $0x108] sm:$0xff] }
  0x32   :  { %164 = vmatprep.subr.mxu0 %v115_v17  ;;  %241 = vmatprep.subr.mxu1 %v117_v18  ;;  %v105_v30 = vld [vmem:[#allocation6 + $0x118] sm:$0xff]  ;;  %v102_v31 = vld [vmem:[#allocation6 + $0x100] sm:$0xff]  ;;  %v104_v32 = vld [vmem:[#allocation6 + $0x110] sm:$0xff] }
  0x33   :  { %165 = vmatpush1.msra.mxu0 %v114_v19  ;;  %242 = vmatpush1.msra.mxu1 %v116_v20  ;;  %v99_v33 = vld [vmem:[#allocation6 + $0xe8] sm:$0xff]  ;;  %v101_v34 = vld [vmem:[#allocation6 + $0xf8] sm:$0xff]  ;;  %v98_v35 = vld [vmem:[#allocation6 + $0xe0] sm:$0xff] }
  0x34   :  { %166 = vmatprep.subr.mxu0 %v111_v21  ;;  %243 = vmatprep.subr.mxu1 %v113_v22  ;;  %v100_v36 = vld [vmem:[#allocation6 + $0xf0] sm:$0xff]  ;;  %v95_v37 = vld [vmem:[#allocation6 + $0xc8] sm:$0xff]  ;;  %v97_v38 = vld [vmem:[#allocation6 + $0xd8] sm:$0xff] }
  0x35   :  { %167 = vmatpush1.msra.mxu0 %v110_v23  ;;  %244 = vmatpush1.msra.mxu1 %v112_v24  ;;  %v94_v39 = vld [vmem:[#allocation6 + $0xc0] sm:$0xff]  ;;  %v96_v40 = vld [vmem:[#allocation6 + $0xd0] sm:$0xff]  ;;  %v91_v41 = vld [vmem:[#allocation6 + $0xa8] sm:$0xff] }
  0x36   :  { %168 = vmatprep.subr.mxu0 %v107_v25  ;;  %245 = vmatprep.subr.mxu1 %v109_v26  ;;  %v93_v42 = vld [vmem:[#allocation6 + $0xb8] sm:$0xff]  ;;  %v90_v43 = vld [vmem:[#allocation6 + $0xa0] sm:$0xff]  ;;  %v92_v44 = vld [vmem:[#allocation6 + $0xb0] sm:$0xff] }
  0x37   :  { %169 = vmatpush1.msra.mxu0 %v106_v27  ;;  %246 = vmatpush1.msra.mxu1 %v108_v28  ;;  %v87_v45 = vld [vmem:[#allocation6 + $0x88] sm:$0xff]  ;;  %v89_v46 = vld [vmem:[#allocation6 + $0x98] sm:$0xff]  ;;  %v86_v47 = vld [vmem:[#allocation6 + $0x80] sm:$0xff] }
  0x38   :  { %170 = vmatprep.subr.mxu0 %v103_v29  ;;  %247 = vmatprep.subr.mxu1 %v105_v30  ;;  %v88_v48 = vld [vmem:[#allocation6 + $0x90] sm:$0xff]  ;;  %v83_v49 = vld [vmem:[#allocation6 + $0x68] sm:$0xff]  ;;  %v85_v50 = vld [vmem:[#allocation6 + $0x78] sm:$0xff] }
  0x39   :  { %171 = vmatpush1.msra.mxu0 %v102_v31  ;;  %248 = vmatpush1.msra.mxu1 %v104_v32  ;;  %v82_v51 = vld [vmem:[#allocation6 + $0x60] sm:$0xff]  ;;  %v84_v52 = vld [vmem:[#allocation6 + $0x70] sm:$0xff]  ;;  %v79_v53 = vld [vmem:[#allocation6 + $0x48] sm:$0xff] }
  0x3a   :  { %172 = vmatprep.subr.mxu0 %v99_v33  ;;  %249 = vmatprep.subr.mxu1 %v101_v34  ;;  %v81_v54 = vld [vmem:[#allocation6 + $0x58] sm:$0xff]  ;;  %v78_v55 = vld [vmem:[#allocation6 + $0x40] sm:$0xff]  ;;  %v80_v56 = vld [vmem:[#allocation6 + $0x50] sm:$0xff] }
  0x3b   :  { %173 = vmatpush1.msra.mxu0 %v98_v35  ;;  %250 = vmatpush1.msra.mxu1 %v100_v36  ;;  %v75_v57 = vld [vmem:[#allocation6 + $0x28] sm:$0xff]  ;;  %v77_v58 = vld [vmem:[#allocation6 + $0x38] sm:$0xff]  ;;  %v74_v59 = vld [vmem:[#allocation6 + $0x20] sm:$0xff] }
  0x3c   :  { %174 = vmatprep.subr.mxu0 %v95_v37  ;;  %251 = vmatprep.subr.mxu1 %v97_v38  ;;  %v76_v60 = vld [vmem:[#allocation6 + $0x30] sm:$0xff]  ;;  %v71_v61 = vld [vmem:[#allocation6 + $0x8] sm:$0xff]  ;;  %v73_v62 = vld [vmem:[#allocation6 + $0x18] sm:$0xff] }
  0x3d   :  { %175 = vmatpush1.msra.mxu0 %v94_v39  ;;  %252 = vmatpush1.msra.mxu1 %v96_v40  ;;  %v70_v63 = vld [vmem:[#allocation6] sm:$0xff]  ;;  %v72_v1 = vld [vmem:[#allocation6 + $0x10] sm:$0xff]  ;;  %v383_v3 = vld [vmem:[#allocation8 + $0xf8] sm:$0xff] }
  0x3e   :  { %176 = vmatprep.subr.mxu0 %v91_v41  ;;  %253 = vmatprep.subr.mxu1 %v93_v42  ;;  %v68_v2 = vld [vmem:[#allocation3] sm:$0xff]  ;;  %v415_v4 = vld [vmem:[#allocation8 + $0x1f8] sm:$0xff]  ;;  %v381_v12 = vld [vmem:[#allocation8 + $0xe8] sm:$0xff] }
  0x3f   :  { %177 = vmatpush1.msra.mxu0 %v90_v43  ;;  %254 = vmatpush1.msra.mxu1 %v92_v44  ;;  %v367_v5 = vld [vmem:[#allocation8 + $0x78] sm:$0xff]  ;;  %v382_v8 = vld [vmem:[#allocation8 + $0xf0] sm:$0xff]  ;;  %v413_v13 = vld [vmem:[#allocation8 + $0x1e8] sm:$0xff] }
  0x40   :  { %178 = vmatprep.subr.mxu0 %v87_v45  ;;  %255 = vmatprep.subr.mxu1 %v89_v46  ;;  %v399_v6 = vld [vmem:[#allocation8 + $0x178] sm:$0xff]  ;;  %v414_v9 = vld [vmem:[#allocation8 + $0x1f0] sm:$0xff]  ;;  %v365_v14 = vld [vmem:[#allocation8 + $0x68] sm:$0xff] }
  0x41   :  { %179 = vmatpush1.msra.mxu0 %v86_v47  ;;  %256 = vmatpush1.msra.mxu1 %v88_v48  ;;  %v69_v7 = vld [vmem:[#allocation3 + $0x8] sm:$0xff]  ;;  %v366_v10 = vld [vmem:[#allocation8 + $0x70] sm:$0xff]  ;;  %v397_v15 = vld [vmem:[#allocation8 + $0x168] sm:$0xff] }
  0x42   :  { %180 = vmatprep.subr.mxu0 %v83_v49  ;;  %257 = vmatprep.subr.mxu1 %v85_v50  ;;  %v398_v11 = vld [vmem:[#allocation8 + $0x170] sm:$0xff]  ;;  %v412_v16 = vld [vmem:[#allocation8 + $0x1e0] sm:$0xff]  ;;  %v379_v19 = vld [vmem:[#allocation8 + $0xd8] sm:$0xff] }
  0x43   :  { %181 = vmatpush1.msra.mxu0 %v82_v51  ;;  %258 = vmatpush1.msra.mxu1 %v84_v52  ;;  %v364_v17 = vld [vmem:[#allocation8 + $0x60] sm:$0xff]  ;;  %v411_v20 = vld [vmem:[#allocation8 + $0x1d8] sm:$0xff]  ;;  %v378_v23 = vld [vmem:[#allocation8 + $0xd0] sm:$0xff] }
  0x44   :  { %182 = vmatprep.subr.mxu0 %v79_v53  ;;  %259 = vmatprep.subr.mxu1 %v81_v54  ;;  %v396_v18 = vld [vmem:[#allocation8 + $0x160] sm:$0xff]  ;;  %v363_v21 = vld [vmem:[#allocation8 + $0x58] sm:$0xff]  ;;  %v410_v24 = vld [vmem:[#allocation8 + $0x1d0] sm:$0xff] }
  0x45   :  { %183 = vmatpush1.msra.mxu0 %v78_v55  ;;  %260 = vmatpush1.msra.mxu1 %v80_v56  ;;  %v395_v22 = vld [vmem:[#allocation8 + $0x158] sm:$0xff]  ;;  %v362_v25 = vld [vmem:[#allocation8 + $0x50] sm:$0xff]  ;;  %v377_v27 = vld [vmem:[#allocation8 + $0xc8] sm:$0xff] }
  0x46   :  { %184 = vmatprep.subr.mxu0 %v75_v57  ;;  %261 = vmatprep.subr.mxu1 %v77_v58  ;;  %v394_v26 = vld [vmem:[#allocation8 + $0x150] sm:$0xff]  ;;  %v409_v28 = vld [vmem:[#allocation8 + $0x1c8] sm:$0xff]  ;;  %v376_v31 = vld [vmem:[#allocation8 + $0xc0] sm:$0xff] }
  0x47   :  { %185 = vmatpush1.msra.mxu0 %v74_v59  ;;  %262 = vmatpush1.msra.mxu1 %v76_v60  ;;  %v361_v29 = vld [vmem:[#allocation8 + $0x48] sm:$0xff]  ;;  %v408_v32 = vld [vmem:[#allocation8 + $0x1c0] sm:$0xff]  ;;  %v375_v35 = vld [vmem:[#allocation8 + $0xb8] sm:$0xff] }
  0x48   :  { %186 = vmatprep.subr.mxu0 %v71_v61  ;;  %263 = vmatprep.subr.mxu1 %v73_v62  ;;  %v393_v30 = vld [vmem:[#allocation8 + $0x148] sm:$0xff]  ;;  %v360_v33 = vld [vmem:[#allocation8 + $0x40] sm:$0xff]  ;;  %v407_v36 = vld [vmem:[#allocation8 + $0x1b8] sm:$0xff] }
  0x49   :  { %187 = vmatpush1.msra.mxu0 %v70_v63  ;;  %264 = vmatpush1.msra.mxu1 %v72_v1  ;;  %v392_v34 = vld [vmem:[#allocation8 + $0x140] sm:$0xff]  ;;  %v359_v37 = vld [vmem:[#allocation8 + $0x38] sm:$0xff]  ;;  %v374_v39 = vld [vmem:[#allocation8 + $0xb0] sm:$0xff] }
  0x4a   :  { %221 = vmatmul.mubr.f32.vlgmr.msra.gmra.mxu0 %v68_v2  ;;  %298 = vmatmul.mubr.f32.vlgmr.msra.gmra.mxu1 %v68_v2  ;;  %v391_v38 = vld [vmem:[#allocation8 + $0x138] sm:$0xff]  ;;  %v406_v40 = vld [vmem:[#allocation8 + $0x1b0] sm:$0xff]  ;;  %v373_v43 = vld [vmem:[#allocation8 + $0xa8] sm:$0xff] }
  0x4b   :  { %226 = vmatprep.mubr.f32.mxu0 %v799_v0  ;;  %303 = vmatprep.mubr.f32.mxu1 %v799_v0  ;;  %v380_v0 = vld [vmem:[#allocation8 + $0xe0] sm:$0xff]  ;;  %v358_v41 = vld [vmem:[#allocation8 + $0x30] sm:$0xff]  ;;  %v405_v44 = vld [vmem:[#allocation8 + $0x1a8] sm:$0xff] }
  0x4c   :  { %605 = vmatprep.subr.mxu0 %v383_v3  ;;  %643 = vmatprep.subr.mxu1 %v415_v4  ;;  %v390_v42 = vld [vmem:[#allocation8 + $0x130] sm:$0xff]  ;;  %v357_v45 = vld [vmem:[#allocation8 + $0x28] sm:$0xff]  ;;  %v372_v47 = vld [vmem:[#allocation8 + $0xa0] sm:$0xff]  ;;  %v136_v4 = vlaneseq }
  0x4d   :  { %606 = vmatpush3.msra.mxu0 %v367_v5  ;;  %644 = vmatpush3.msra.mxu1 %v399_v6  ;;  %v389_v46 = vld [vmem:[#allocation8 + $0x128] sm:$0xff]  ;;  %v404_v48 = vld [vmem:[#allocation8 + $0x1a0] sm:$0xff]  ;;  %v371_v51 = vld [vmem:[#allocation8 + $0x98] sm:$0xff] }
  0x4e   :  { %227 = vmatmul.mubr.f32.gmra.mxu0 %v69_v7  ;;  %304 = vmatmul.mubr.f32.gmra.mxu1 %v69_v7  ;;  %v356_v49 = vld [vmem:[#allocation8 + $0x20] sm:$0xff]  ;;  %v403_v52 = vld [vmem:[#allocation8 + $0x198] sm:$0xff]  ;;  %v370_v55 = vld [vmem:[#allocation8 + $0x90] sm:$0xff]  ;;  %v137_v5 = vshrl.u32 %v136_v4, 7 }
  0x4f   :  { %607 = vmatprep.subr.mxu0 %v382_v8  ;;  %645 = vmatprep.subr.mxu1 %v414_v9  ;;  %v388_v50 = vld [vmem:[#allocation8 + $0x120] sm:$0xff]  ;;  %v355_v53 = vld [vmem:[#allocation8 + $0x18] sm:$0xff]  ;;  %v402_v56 = vld [vmem:[#allocation8 + $0x190] sm:$0xff] }
  0x50   :  { %608 = vmatpush3.msra.mxu0 %v366_v10  ;;  %646 = vmatpush3.msra.mxu1 %v398_v11  ;;  %v387_v54 = vld [vmem:[#allocation8 + $0x118] sm:$0xff]  ;;  %v354_v57 = vld [vmem:[#allocation8 + $0x10] sm:$0xff]  ;;  %v369_v59 = vld [vmem:[#allocation8 + $0x88] sm:$0xff]  ;;  %v138_v6 = vsub.s32 0, %v137_v5  ;;  %v146_v7 = vsub.s32 2, %v137_v5  ;;  %v142_v9 = vsub.s32 1, %v137_v5 }
  0x51   :  { %609 = vmatprep.subr.mxu0 %v381_v12  ;;  %647 = vmatprep.subr.mxu1 %v413_v13  ;;  %v386_v58 = vld [vmem:[#allocation8 + $0x110] sm:$0xff]  ;;  %v401_v60 = vld [vmem:[#allocation8 + $0x188] sm:$0xff]  ;;  %v368_v63 = vld [vmem:[#allocation8 + $0x80] sm:$0xff]  ;;  %v150_v10 = vsub.s32 3, %v137_v5 }
  0x52   :  { %610 = vmatpush3.msra.mxu0 %v365_v14  ;;  %648 = vmatpush3.msra.mxu1 %v397_v15  ;;  %v353_v61 = vld [vmem:[#allocation8 + $0x8] sm:$0xff]  ;;  %v400_v1 = vld [vmem:[#allocation8 + $0x180] sm:$0xff]  ;;  %v134_v8 = vld [vmem:[%s864_s2] sm:$0xf] }
  0x53   :  { %611 = vmatprep.subr.mxu0 %v380_v0  ;;  %649 = vmatprep.subr.mxu1 %v412_v16  ;;  %v385_v62 = vld [vmem:[#allocation8 + $0x108] sm:$0xff]  ;;  %v352_v2 = vld [vmem:[#allocation8] sm:$0xff]  ;;  %v139_v11 = vrot.slane %v134_v8, %v138_v6  ;;  %v147_v12 = vrot.slane %v134_v8, %v146_v7  ;;  %v143_v15 = vrot.slane %v134_v8, %v142_v9 }
  0x54   :  { %612 = vmatpush3.msra.mxu0 %v364_v17  ;;  %650 = vmatpush3.msra.mxu1 %v396_v18  ;;  %v384_v3 = vld [vmem:[#allocation8 + $0x100] sm:$0xff]  ;;  %v151_v0 = vrot.slane %v134_v8, %v150_v10 }
  0x55   :  { %613 = vmatprep.subr.mxu0 %v379_v19  ;;  %651 = vmatprep.subr.mxu1 %v411_v20 }
  0x56   :  { %614 = vmatpush3.msra.mxu0 %v363_v21  ;;  %652 = vmatpush3.msra.mxu1 %v395_v22 }
  0x57   :  { %615 = vmatprep.subr.mxu0 %v378_v23  ;;  %653 = vmatprep.subr.mxu1 %v410_v24 }
  0x58   :  { %616 = vmatpush3.msra.mxu0 %v362_v25  ;;  %654 = vmatpush3.msra.mxu1 %v394_v26 }
  0x59   :  { %617 = vmatprep.subr.mxu0 %v377_v27  ;;  %655 = vmatprep.subr.mxu1 %v409_v28 }
  0x5a   :  { %618 = vmatpush3.msra.mxu0 %v361_v29  ;;  %656 = vmatpush3.msra.mxu1 %v393_v30 }
  0x5b   :  { %619 = vmatprep.subr.mxu0 %v376_v31  ;;  %657 = vmatprep.subr.mxu1 %v408_v32 }
  0x5c   :  { %620 = vmatpush3.msra.mxu0 %v360_v33  ;;  %658 = vmatpush3.msra.mxu1 %v392_v34 }
  0x5d   :  { %621 = vmatprep.subr.mxu0 %v375_v35  ;;  %659 = vmatprep.subr.mxu1 %v407_v36 }
  0x5e   :  { %622 = vmatpush3.msra.mxu0 %v359_v37  ;;  %660 = vmatpush3.msra.mxu1 %v391_v38 }
  0x5f   :  { %623 = vmatprep.subr.mxu0 %v374_v39  ;;  %661 = vmatprep.subr.mxu1 %v406_v40 }
  0x60   :  { %624 = vmatpush3.msra.mxu0 %v358_v41  ;;  %662 = vmatpush3.msra.mxu1 %v390_v42 }
  0x61   :  { %625 = vmatprep.subr.mxu0 %v373_v43  ;;  %663 = vmatprep.subr.mxu1 %v405_v44 }
  0x62   :  { %626 = vmatpush3.msra.mxu0 %v357_v45  ;;  %664 = vmatpush3.msra.mxu1 %v389_v46 }
  0x63   :  { %627 = vmatprep.subr.mxu0 %v372_v47  ;;  %665 = vmatprep.subr.mxu1 %v404_v48 }
  0x64   :  { %628 = vmatpush3.msra.mxu0 %v356_v49  ;;  %666 = vmatpush3.msra.mxu1 %v388_v50 }
  0x65   :  { %629 = vmatprep.subr.mxu0 %v371_v51  ;;  %667 = vmatprep.subr.mxu1 %v403_v52 }
  0x66   :  { %630 = vmatpush3.msra.mxu0 %v355_v53  ;;  %668 = vmatpush3.msra.mxu1 %v387_v54 }
  0x67   :  { %631 = vmatprep.subr.mxu0 %v370_v55  ;;  %669 = vmatprep.subr.mxu1 %v402_v56 }
  0x68   :  { %632 = vmatpush3.msra.mxu0 %v354_v57  ;;  %670 = vmatpush3.msra.mxu1 %v386_v58 }
  0x69   :  { %633 = vmatprep.subr.mxu0 %v369_v59  ;;  %671 = vmatprep.subr.mxu1 %v401_v60 }
  0x6a   :  { %634 = vmatpush3.msra.mxu0 %v353_v61  ;;  %672 = vmatpush3.msra.mxu1 %v385_v62 }
  0x6b   :  { %635 = vmatprep.subr.mxu0 %v368_v63  ;;  %673 = vmatprep.subr.mxu1 %v400_v1 }
  0x6c   :  { %636 = vmatpush3.msra.mxu0 %v352_v2  ;;  %674 = vmatpush3.msra.mxu1 %v384_v3 }
 0x10a   :  { %v222_v13 = vpop.f32.mrf.mxu0  ;;  %v299_v14 = vpop.f32.mrf.mxu1 }
 0x10b   :  { %v223_v16 = vadd.f32 %v222_v13, %v139_v11  ;;  %v300_v17 = vadd.f32 %v299_v14, %v147_v12  ;;  %v604_v14 = vld [vmem:[%s866_s4] ss:$0 sm:$0xff] }
 0x10c   :  { %v224_v18 = vpop.f32.mrf.mxu0  ;;  %v301_v19 = vpop.f32.mrf.mxu1 }
 0x10d   :  { %v318_v20 = vmul.f32 0.70710677, %v223_v16  ;;  %v320_v21 = vmul.f32 0.70710677, %v300_v17  ;;  %v225_v22 = vadd.f32 %v224_v18, %v143_v15  ;;  %v302_v23 = vadd.f32 %v301_v19, %v151_v0 }
 0x10e   :  { %v228_v24 = vpop.f32.mrf.mxu0  ;;  %v305_v25 = vpop.f32.mrf.mxu1  ;;  %v310_v47 = vmul.f32 0.5, %v223_v16  ;;  %v312_v51 = vmul.f32 0.5, %v300_v17 }
 0x10f   :  { %690 = verf.f32 %v318_v20  ;;  %v229_v26 = vadd.f32 %v228_v24, %v139_v11  ;;  %v306_v27 = vadd.f32 %v305_v25, %v147_v12  ;;  %v319_v28 = vmul.f32 0.70710677, %v225_v22 }
 0x110   :  { %692 = verf.f32 %v320_v21  ;;  %v230_v29 = vpop.f32.mrf.mxu0  ;;  %v307_v30 = vpop.f32.mrf.mxu1  ;;  %v321_v31 = vmul.f32 0.70710677, %v302_v23  ;;  %v311_v44 = vmul.f32 0.5, %v225_v22  ;;  %v313_v48 = vmul.f32 0.5, %v302_v23 }
 0x111   :  { %v322_v32 = vmul.f32 0.70710677, %v229_v26  ;;  %694 = verf.f32 %v319_v28  ;;  %v324_v33 = vmul.f32 0.70710677, %v306_v27  ;;  %v231_v34 = vadd.f32 %v230_v29, %v143_v15 }
 0x112   :  { %v308_v35 = vadd.f32 %v307_v30, %v151_v0  ;;  %696 = verf.f32 %v321_v31  ;;  %v314_v62 = vmul.f32 0.5, %v229_v26  ;;  %v316_v2 = vmul.f32 0.5, %v306_v27 }
 0x113   :  { %698 = verf.f32 %v322_v32  ;;  %v323_v36 = vmul.f32 0.70710677, %v231_v34  ;;  %v315_v59 = vmul.f32 0.5, %v231_v34 }
 0x114   :  { %700 = verf.f32 %v324_v33  ;;  %v325_v37 = vmul.f32 0.70710677, %v308_v35  ;;  %v317_v63 = vmul.f32 0.5, %v308_v35 }
 0x115   :  { %702 = verf.f32 %v323_v36 }
 0x116   :  { %704 = verf.f32 %v325_v37 }
 0x11c   :  { %v691_v38 = vpop.eup %690 }
 0x11d   :  { %v693_v39 = vpop.eup %692  ;;  %v334_v41 = vadd.f32 1.0, %v691_v38 }
 0x11e   :  { %v695_v40 = vpop.eup %694  ;;  %v336_v43 = vadd.f32 1.0, %v693_v39 }
 0x11f   :  { %v697_v42 = vpop.eup %696  ;;  %v335_v45 = vadd.f32 1.0, %v695_v40  ;;  %v342_v54 = vmul.f32 %v334_v41, %v310_v47 }
 0x120   :  { %v699_v46 = vpop.eup %698  ;;  %v337_v49 = vadd.f32 1.0, %v697_v42  ;;  %v344_v58 = vmul.f32 %v336_v43, %v312_v51 }
 0x121   :  { %v701_v50 = vpop.eup %700  ;;  %v343_v52 = vmul.f32 %v335_v45, %v311_v44  ;;  %v338_v56 = vadd.f32 1.0, %v699_v46 }
 0x122   :  { %v703_v53 = vpop.eup %702  ;;  %v345_v55 = vmul.f32 %v337_v49, %v313_v48  ;;  %v340_v61 = vadd.f32 1.0, %v701_v50 }
 0x123   :  { %v705_v57 = vpop.eup %704  ;;  %480 = vmatprep.mubr.f32.mxu0 %v343_v52  ;;  %v339_v60 = vadd.f32 1.0, %v703_v53  ;;  %v346_v5 = vmul.f32 %v338_v56, %v314_v62 }
 0x124   :  { %555 = vmatprep.mubr.f32.mxu1 %v345_v55  ;;  %481 = vmatmul.mubr.f32.vlgmr.msra.gmra.mxu0 %v342_v54  ;;  %v341_v1 = vadd.f32 1.0, %v705_v57  ;;  %v348_v6 = vmul.f32 %v340_v61, %v316_v2 }
 0x125   :  { %556 = vmatmul.mubr.f32.vlgmr.msra.gmra.mxu1 %v344_v58  ;;  %v347_v3 = vmul.f32 %v339_v60, %v315_v59 }
 0x126   :  { %v349_v4 = vmul.f32 %v341_v1, %v317_v63 }
 0x127   :  { %485 = vmatprep.mubr.f32.mxu0 %v347_v3 }
 0x128   :  { %560 = vmatprep.mubr.f32.mxu1 %v349_v4  ;;  %486 = vmatmul.mubr.f32.gmra.mxu0 %v346_v5 }
 0x129   :  { %561 = vmatmul.mubr.f32.gmra.mxu1 %v348_v6 }
 0x1e4   :  { %v637_v7 = vpop.f32.mrf.mxu0 }
 0x1e5   :  { %v675_v8 = vpop.f32.mrf.mxu1 }
 0x1e6   :  { %v638_v9 = vpop.f32.mrf.mxu0 }
 0x1e7   :  { %v639_v10 = vadd.f32 %v638_v9, %v637_v7  ;;  %v676_v11 = vpop.f32.mrf.mxu1 }
 0x1e8   :  { %v677_v12 = vadd.f32 %v676_v11, %v675_v8  ;;  %v640_v13 = vpop.f32.mrf.mxu0 }
 0x1e9   :  { %v678_v15 = vpop.f32.mrf.mxu1 }
 0x1ea   :  { %v558_v0 = vadd.f32 %v677_v12, %v639_v10  ;;  %v641_v16 = vpop.f32.mrf.mxu0 }
 0x1eb   :  { %v642_v17 = vadd.f32 %v641_v16, %v640_v13  ;;  %v679_v18 = vpop.f32.mrf.mxu1 }
 0x1ec   :  { %v582_v19 = vadd.f32 %v604_v14, %v558_v0  ;;  %v680_v20 = vadd.f32 %v679_v18, %v678_v15 }
 0x1ee   :  { %584 = vst [vmem:[#allocation9] sm:$0xff] %v582_v19  ;;  %v563_v21 = vadd.f32 %v680_v20, %v642_v17 }
 0x1f0   :  { %v583_v22 = vadd.f32 %v604_v14, %v563_v21 }
 0x1f2   :  { %585 = vst [vmem:[#allocation9 + $0x8] sm:$0xff] %v583_v22 }
 0x1f3   :  { %777 = shalt.err (!%p774_p5)
}
 0x1f4   :  { %597 = dma.vmem_to_hbm [thread:$0]  %s592_s13, 256, %s867_s5, [#allocation5], %s796_s28, %s796_s28, %s797_s29  }
 0x1f5   :  { %790 = dma.done.wait [#allocation5], 256  }
 0x1f6   :  { %791 = vsyncadd [#allocation5], 4294967040 }
 0x1f7   :  { %601 = vsyncpa [#allocation4], 1 }
 0x1f8   :  { %602 = vsyncpa [#allocation7], 1 }
 0x1f9   :  { %603 = vsyncpa [#allocation5], 1 }

</bundles_post_ra>
